<compile_context>
chip_gen: v7x
topology: tpu7x:2x2x1
jax: 0.10.0
libtpu: 0.0.40
codegen_flags: <defaults>
</compile_context>

<pallas_src>
import jax
import jax.numpy as jnp
from jax.experimental import pallas as pl
from jax.experimental.pallas import tpu as pltpu

_VMEM_LIMIT = 48 * 1024 * 1024   # <= ~48 MiB keeps double-buffering legal on v7x too


# ----------------------- inference kernel (no targets) --------------------- #

def linear_sigmoid_kernel(x_ref, w_ref, b_ref, out_ref):
    # MXU matmul, f32 accumulation; exact sigmoid (exp on EUP, divide is cheap and
    # the kernel is bandwidth-bound anyway).
    z = jnp.dot(x_ref[...], w_ref[...], preferred_element_type=jnp.float32)
    z = z + b_ref[...]
    out_ref[...] = (1.0 / (1.0 + jnp.exp(-z))).astype(out_ref.dtype)


# ------------------ fused training kernel (loss in one pass) --------------- #

def make_loss_kernel(tile_b, tiles_per_core, n_valid):
    def loss_kernel(x_ref, wt_ref, bt_ref, y_ref, out_ref, acc_ref):
        c = pl.program_id(0)          # TensorCore split (v7x megacore)
        i = pl.program_id(1)          # batch-tile index within this core's half

        @pl.when(i == 0)
        def _init():
            acc_ref[...] = jnp.zeros_like(acc_ref)

        # Transposed compute: z^T = W @ x^T -> (C, tile_b), lane-dense everywhere.
        z = jax.lax.dot_general(
            wt_ref[...], x_ref[...],
            dimension_numbers=(((1,), (1,)), ((), ())),
            preferred_element_type=jnp.float32)            # (C, tile_b)
        z = z + bt_ref[...]                                 # (C, tile_b) + (C, 1)
        p = 1.0 / (1.0 + jnp.exp(-z))                       # exact sigmoid, f32

        # PyTorch CrossEntropyLoss applied to the sigmoid output:
        #   nll_b = logsumexp(p[:, b]) - p[y_b, b]
        # p in (0,1) so exp(p) in (1,e): no max-shift needed.
        lse = jnp.log(jnp.sum(jnp.exp(p), axis=0, keepdims=True))       # (1, tile_b)
        cls = jax.lax.broadcasted_iota(jnp.int32, p.shape, 0)           # (C, tile_b)
        picked = jnp.sum(jnp.where(cls == y_ref[...], p, 0.0),
                         axis=0, keepdims=True)                         # (1, tile_b)
        nll = lse - picked                                              # (1, tile_b)

        # Mask padded columns of a ragged last tile / duplicated (clamped) tiles.
        off = (c * tiles_per_core + i) * tile_b
        col = jax.lax.broadcasted_iota(jnp.int32, nll.shape, 1) + off
        masked = jnp.where(col < n_valid, nll, 0.0)
        acc_ref[...] += jnp.sum(masked, axis=1, keepdims=True)          # (1, 1)

        @pl.when(i == pl.num_programs(1) - 1)
        def _finalize():
            # Per-core partial sum -> this core's own 128-lane output block.
            out_ref[...] = jnp.broadcast_to(acc_ref[...], out_ref.shape)

    return loss_kernel


# --------------------------------- wrapper --------------------------------- #

def torch_model_forward(x, w, b, y=None, *, max_tile_b=8192, input_dtype=None):
    """x: (B, K), w: (K, 3), b: (1, 3), y: optional (B,) int class indices.

    input_dtype=jnp.bfloat16 halves HBM traffic for x/W on v6e/v7x; accumulation and
    all elementwise math remain f32.
    """
    B, K = x.shape
    C = w.shape[1]

    if y is None:
        # ---- inference: pack 128/K rows per vreg row (block-diagonal weight) ----
        pack = 1
        if 128 % K == 0 and (128 // K) > 1 and B % (128 // K) == 0:
            pack = 128 // K
        xk = x.reshape(B // pack, pack * K)                       # free view
        if pack > 1:
            wk = jax.scipy.linalg.block_diag(*([w] * pack))       # (pack*K, pack*C)
            bk = jnp.tile(b.reshape(1, C), (1, pack))             # (1, pack*C)
        else:
            wk, bk = w, b.reshape(1, C)
        if input_dtype is not None:
            xk = xk.astype(input_dtype)
            wk = wk.astype(input_dtype)

        rows = B // pack
        tile_rows = rows if rows <= max_tile_b else max_tile_b    # big tiles: amortize
        grid = (pl.cdiv(rows, tile_rows),)                        # no host-side pad

        out = pl.pallas_call(
            linear_sigmoid_kernel,
            out_shape=jax.ShapeDtypeStruct((rows, pack * C), jnp.float32),
            grid=grid,
            in_specs=[
                pl.BlockSpec((tile_rows, pack * K), lambda i: (i, 0)),  # x tile streams
                pl.BlockSpec((pack * K, pack * C), lambda i: (0, 0)),   # W resident
                pl.BlockSpec((1, pack * C), lambda i: (0, 0)),          # b resident
            ],
            out_specs=pl.BlockSpec((tile_rows, pack * C), lambda i: (i, 0)),
            compiler_params=pltpu.CompilerParams(
                dimension_semantics=("parallel",),                # megacore-splittable
                vmem_limit_bytes=_VMEM_LIMIT),
        )(xk, wk, bk)
        return out.reshape(B, C)

    # ---- training: fused matmul + sigmoid + CE + mean, transposed layout ----
    xin = x
    wt = w.T                                                      # (C, K)
    if input_dtype is not None:
        xin = xin.astype(input_dtype)
        wt = wt.astype(input_dtype)
    bt = b.reshape(C, 1).astype(jnp.float32)                      # (C, 1)
    y2 = y.astype(jnp.int32).reshape(1, B)                        # lane-dense labels

    tile_b = B if B <= max_tile_b else max_tile_b
    n_blocks = pl.cdiv(B, tile_b)
    tiles_per_core = pl.cdiv(n_blocks, 2)     # outer "parallel" axis feeds v7x's 2 TCs

    def x_map(c, i):
        # Clamp so a core's surplus tile re-reads an in-bounds block (contribution is
        # zeroed by the in-kernel column mask).
        return (jnp.minimum(c * tiles_per_core + i, n_blocks - 1), 0)

    def y_map(c, i):
        return (0, jnp.minimum(c * tiles_per_core + i, n_blocks - 1))

    out = pl.pallas_call(
        make_loss_kernel(tile_b, tiles_per_core, B),
        out_shape=jax.ShapeDtypeStruct((1, 2 * 128), jnp.float32),  # one 128-lane block/core
        grid=(2, tiles_per_core),
        in_specs=[
            pl.BlockSpec((tile_b, K), x_map),                     # x tile streams
            pl.BlockSpec((C, K), lambda c, i: (0, 0)),            # W^T resident
            pl.BlockSpec((C, 1), lambda c, i: (0, 0)),            # b^T resident
            pl.BlockSpec((1, tile_b), y_map),                     # labels, lane-dense
        ],
        out_specs=pl.BlockSpec((1, 128), lambda c, i: (0, c)),
        scratch_shapes=[pltpu.VMEM((1, 1), jnp.float32)],         # per-core NLL sum
        compiler_params=pltpu.CompilerParams(
            dimension_semantics=("parallel", "arbitrary"),
            vmem_limit_bytes=_VMEM_LIMIT),
    )(xin, wt, bt, y2)

    partials = out.reshape(2, 128)[:, 0]                          # one partial per core
    return jnp.sum(partials) / B


# ----------------------------------- main ---------------------------------- #

if __name__ == "__main__":
    key = jax.random.PRNGKey(0)
    k_x, k_w, k_b, k_y = jax.random.split(key, 4)

    batch = 8
    input_size = 32
    num_classes = 3

    # deterministic "nn.Linear"-style init: U(-1/sqrt(in), 1/sqrt(in))
    bound = 1.0 / (input_size ** 0.5)
    w = jax.random.uniform(k_w, (input_size, num_classes), jnp.float32, -bound, bound)
    b = jax.random.uniform(k_b, (1, num_classes), jnp.float32, -bound, bound)

    x = jax.random.normal(k_x, (batch, input_size), jnp.float32)
    y = jax.random.randint(k_y, (batch,), 0, num_classes, jnp.int32)

    # inference branch (y is None) and training branch (CE on sigmoid output)
    y_pred = torch_model_forward(x, w, b)
    loss = torch_model_forward(x, w, b, y)
    jax.block_until_ready((y_pred, loss))

    assert y_pred.shape == (batch, num_classes)
    assert loss.shape == ()

    # pure-JAX reference (exact sigmoid in-kernel -> tight tolerances now)
    z_ref = x @ w + b
    p_ref = jax.nn.sigmoid(z_ref)
    lse_ref = jax.scipy.special.logsumexp(p_ref, axis=-1)
    loss_ref = jnp.mean(lse_ref - p_ref[jnp.arange(batch), y])
    assert jnp.allclose(y_pred, p_ref, atol=1e-3, rtol=1e-3)
    assert jnp.allclose(loss, loss_ref, atol=1e-3, rtol=1e-3)

    # bf16-input variant (HBM-traffic halver for v6e/v7x); f32 accumulation in-kernel.
    y_pred_bf16 = torch_model_forward(x, w, b, input_dtype=jnp.bfloat16)
    loss_bf16 = torch_model_forward(x, w, b, y, input_dtype=jnp.bfloat16)
    jax.block_until_ready((y_pred_bf16, loss_bf16))
    assert jnp.allclose(y_pred_bf16, p_ref, atol=3e-2, rtol=3e-2)
    assert jnp.allclose(loss_bf16, loss_ref, atol=3e-2, rtol=3e-2)

    print("KERNEL_OK")
</pallas_src>

<mosaic_0001>
module attributes {stable_mosaic.version = 11 : i64} {
  func.func @linear_sigmoid_kernel(%arg0: i32, %arg1: memref<2x128xf32, #tpu.memory_space<vmem>>, %arg2: memref<128x12xf32, #tpu.memory_space<vmem>>, %arg3: memref<1x12xf32, #tpu.memory_space<vmem>>, %arg4: memref<2x12xf32, #tpu.memory_space<vmem>>) attributes {dimension_semantics = [#tpu.dimension_semantics<parallel>], iteration_bounds = array<i64: 1>, scalar_prefetch = 0 : i64, scratch_operands = 0 : i64, tpu.core_type = #tpu.core_type<tc>, window_params = [{transform_indices = @transform_0, window_bounds = array<i64: 2, 128>}, {pipeline_mode = #tpu.pipeline_mode<synchronous>, transform_indices = @transform_1, window_bounds = array<i64: 128, 12>}, {pipeline_mode = #tpu.pipeline_mode<synchronous>, transform_indices = @transform_2, window_bounds = array<i64: 1, 12>}, {transform_indices = @transform_3, window_bounds = array<i64: 2, 12>}]} {
    %c0 = arith.constant 0 : index
    %c0_0 = arith.constant 0 : index
    %0 = vector.load %arg1[%c0, %c0_0] : memref<2x128xf32, #tpu.memory_space<vmem>>, vector<2x128xf32>
    %c0_1 = arith.constant 0 : index
    %c0_2 = arith.constant 0 : index
    %1 = vector.load %arg2[%c0_1, %c0_2] : memref<128x12xf32, #tpu.memory_space<vmem>>, vector<128x12xf32>
    %cst = arith.constant dense<0.000000e+00> : vector<2x12xf32>
    %2 = tpu.matmul %0, %1, %cst {dimension_numbers = #tpu.dot_dimension_numbers<[1], [0], [0], [1], [0, 0, 1, 1], [], []>} : vector<2x128xf32>, vector<128x12xf32>, vector<2x12xf32> -> vector<2x12xf32>
    %c0_3 = arith.constant 0 : index
    %c0_4 = arith.constant 0 : index
    %3 = vector.load %arg3[%c0_3, %c0_4] : memref<1x12xf32, #tpu.memory_space<vmem>>, vector<1x12xf32>
    %4 = vector.broadcast %3 : vector<1x12xf32> to vector<2x12xf32>
    %5 = arith.addf %2, %4 : vector<2x12xf32>
    %cst_5 = arith.constant 0.000000e+00 : f32
    %6 = vector.broadcast %cst_5 : f32 to vector<2x12xf32>
    %7 = arith.subf %6, %5 : vector<2x12xf32>
    %8 = math.exp %7 : vector<2x12xf32>
    %cst_6 = arith.constant 1.000000e+00 : f32
    %9 = vector.broadcast %cst_6 : f32 to vector<2x12xf32>
    %10 = arith.addf %9, %8 : vector<2x12xf32>
    %cst_7 = arith.constant 1.000000e+00 : f32
    %11 = vector.broadcast %cst_7 : f32 to vector<2x12xf32>
    %12 = arith.divf %11, %10 : vector<2x12xf32>
    %c0_8 = arith.constant 0 : index
    %c0_9 = arith.constant 0 : index
    %13 = vector.load %arg4[%c0_8, %c0_9] : memref<2x12xf32, #tpu.memory_space<vmem>>, vector<2x12xf32>
    tpu.vector_store %arg4[%c0_8, %c0_9], %12 {strides = array<i32>} : memref<2x12xf32, #tpu.memory_space<vmem>>, vector<2x12xf32>,
    return
  }
  func.func @transform_0(%arg0: i32) -> (i32, i32) {
    %c0_i32 = arith.constant 0 : i32
    %c0_i32_0 = arith.constant 0 : i32
    return %arg0, %c0_i32 : i32, i32
  }
  func.func @transform_1(%arg0: i32) -> (i32, i32) {
    %c0_i32 = arith.constant 0 : i32
    %c0_i32_0 = arith.constant 0 : i32
    %c0_i32_1 = arith.constant 0 : i32
    return %c0_i32, %c0_i32_0 : i32, i32
  }
  func.func @transform_2(%arg0: i32) -> (i32, i32) {
    %c0_i32 = arith.constant 0 : i32
    %c0_i32_0 = arith.constant 0 : i32
    %c0_i32_1 = arith.constant 0 : i32
    return %c0_i32, %c0_i32_0 : i32, i32
  }
  func.func @transform_3(%arg0: i32) -> (i32, i32) {
    %c0_i32 = arith.constant 0 : i32
    %c0_i32_0 = arith.constant 0 : i32
    return %arg0, %c0_i32 : i32, i32
  }
}

</mosaic_0001>

<bundles_post_ra>
// kernel: tpu_custom_call.1
= control target key start
LH: loop header
LB: loop body
LE: loop exit
PB: predicated region body
PF: predicated region fallthrough
CT: control target
= control target key end

     0   :  { %v240_v3 = vmov 0.0|0.0   ;;  %vm241_vm0 = vmmov 0   ;;  %v242_v6 = vmov 0.0   ;;  %s330_s0 = inlined_call_operand.vmem [shape: f32[2,128], index: 0, kind: input, shape index: {}]   ;;  %s331_s1 = inlined_call_operand.vmem [shape: f32[128,12], index: 1, kind: input, shape index: {}]   ;;  %s332_s2 = inlined_call_operand.vmem [shape: f32[1,12], index: 2, kind: input, shape index: {}]   ;;  %s333_s3 = inlined_call_operand.hbm [shape: f32[2,12], index: 3, kind: output, shape index: {}]  }
   0x1   :  { %v16_v0 = vld [vmem:[%s331_s1] sm:$0xff]  ;;  %v17_v1 = vld [vmem:[%s331_s1 + $0x8] sm:$0xff]  ;;  %v18_v2 = vld [vmem:[%s331_s1 + $0x10] sm:$0xff]  ;;  %184 = vmatprep.subr.bf16.mxu0 %v240_v3  ;;  %181 = vmatprep.mubr.msk.f32.mxu0 %vm241_vm0, %v242_v6 }
   0x2   :  { %v185_v4 = vpack.c.bf16 %v17_v1, %v16_v0  ;;  %v19_v5 = vld [vmem:[%s331_s1 + $0x18] sm:$0xff]  ;;  %v20_v8 = vld [vmem:[%s331_s1 + $0x20] sm:$0xff]  ;;  %v21_v9 = vld [vmem:[%s331_s1 + $0x28] sm:$0xff] }
   0x3   :  { %v188_v7 = vpack.c.bf16 %v19_v5, %v18_v2 }
   0x4   :  { %186 = vmatpush3.bf16.msra.mxu0 %v185_v4 }
   0x5   :  { %187 = vmatprep.subr.bf16.mxu0 %v240_v3 }
   0x6   :  { %8 = vsyncpa [#allocation3], 0  ;;  %v191_v10 = vpack.c.bf16 %v21_v9, %v20_v8  ;;  %v22_v11 = vld [vmem:[%s331_s1 + $0x30] sm:$0xff]  ;;  %v23_v12 = vld [vmem:[%s331_s1 + $0x38] sm:$0xff]  ;;  %vm115_vm1 = vcmask 91136  }
   0x7   :  { %v194_v13 = vpack.c.bf16 %v23_v12, %v22_v11  ;;  %v24_v14 = vld [vmem:[%s331_s1 + $0x40] sm:$0xff]  ;;  %v25_v15 = vld [vmem:[%s331_s1 + $0x48] sm:$0xff]  ;;  %v26_v17 = vld [vmem:[%s331_s1 + $0x50] sm:$0xff] }
   0x8   :  { %189 = vmatpush3.bf16.msra.mxu0 %v188_v7  ;;  %v197_v16 = vpack.c.bf16 %v25_v15, %v24_v14  ;;  %v27_v18 = vld [vmem:[%s331_s1 + $0x58] sm:$0xff]  ;;  %v28_v20 = vld [vmem:[%s331_s1 + $0x60] sm:$0xff]  ;;  %v29_v21 = vld [vmem:[%s331_s1 + $0x68] sm:$0xff] }
   0x9   :  { %190 = vmatprep.subr.bf16.mxu0 %v240_v3  ;;  %v200_v19 = vpack.c.bf16 %v27_v18, %v26_v17  ;;  %v203_v22 = vpack.c.bf16 %v29_v21, %v28_v20  ;;  %v30_v23 = vld [vmem:[%s331_s1 + $0x70] sm:$0xff]  ;;  %v31_v24 = vld [vmem:[%s331_s1 + $0x78] sm:$0xff]  ;;  %v15_v26 = vld [vmem:[%s330_s0] sm:$0x3]  ;;  %s243_s1 = smov [#allocation2]  }
   0xa   :  { %v206_v25 = vpack.c.bf16 %v31_v24, %v30_v23  ;;  %v131_v27 = vld [vmem:[%s332_s2] ss:$0 sm:$0xff]  ;;  %s123_s21 = sshll.u32 %s243_s1, 4  ;;  %s124_s21 = int_to_ptr.vmem [resolvable:$true] %s123_s21 }
   0xb   :  { %s216_s0 = scalar_lea.vmem %s124_s21, 32  ;;  %p221_p1 = scmp.lt.s32.totalorder %s124_s21, %s124_s21 }
   0xc   :  { %192 = vmatpush3.bf16.msra.mxu0 %v191_v10  ;;  %p217_p0 = scmp.ne.s32.totalorder %s124_s21, %s216_s0  ;;  %p222_p2 = scmp.lt.s32.totalorder %s216_s0, %s216_s0 }
   0xd   :  { %193 = vmatprep.subr.bf16.mxu0 %v240_v3 }
   0xe   :  { %p223_p3 = por %p222_p2, %p221_p1 }
  0x10   :  { %195 = vmatpush3.bf16.msra.mxu0 %v194_v13  ;;  %p224_p4 = pnand %p223_p3, %p217_p0 }
  0x11   :  { %196 = vmatprep.subr.bf16.mxu0 %v240_v3 }
  0x14   :  { %198 = vmatpush3.bf16.msra.mxu0 %v197_v16 }
  0x15   :  { %199 = vmatprep.subr.bf16.mxu0 %v240_v3 }
  0x18   :  { %201 = vmatpush3.bf16.msra.mxu0 %v200_v19 }
  0x19   :  { %202 = vmatprep.subr.bf16.mxu0 %v240_v3 }
  0x1c   :  { %204 = vmatpush3.bf16.msra.mxu0 %v203_v22 }
  0x1d   :  { %205 = vmatprep.subr.bf16.mxu0 %v240_v3 }
  0x20   :  { %207 = vmatpush3.bf16.msra.mxu0 %v206_v25 }
  0x23   :  { %182 = vmatmul.mubr.f32.vlgmr.msra.gmra.mrb[0].mxu0 %v15_v26 }
  0xf6   :  { %v105_v28 = vpop.f32.mrb[0].mxu0 }
  0xf7   :  { %v106_v29 = vadd.f32 %v131_v27, %v105_v28  ;;  %v183_v30 = vpop.f32.mrb[1].mxu0 }
  0xf9   :  { %v109_v31 = vsub.f32 0.0, %v106_v29 }
  0xfb   :  { %v110_v32 = vmul.f32 1.442695, %v109_v31 }
  0xfd   :  { %212 = vpow2.f32 %v110_v32 }
 0x107   :  { %v213_v33 = vpop.eup %212 }
 0x108   :  { %v112_v34 = vadd.f32 1.0, %v213_v33 }
 0x10a   :  { %214 = vrcp.f32 %v112_v34 }
 0x114   :  { %v215_v35 = vpop.eup %214 }
 0x115   :  { %116 = vst.msk [vmem:[#allocation2] sm:$0x3] %vm115_vm1, %v215_v35 }
 0x116   :  { %227 = shalt.err (!%p224_p4)
}
 0x117   :  { %s228_s23 = scalar_lea.hbm %s333_s3, 32 }
 0x118   :  { %p229_p5 = scmp.ne.s32.totalorder %s333_s3, %s228_s23  ;;  %p232_p6 = scmp.lt.u32.totalorder %s228_s23, %s333_s3 }
 0x11a   :  { %p234_p7 = pnand %p232_p6, %p229_p5 }
 0x11c   :  { %237 = shalt.err (!%p234_p7)
}
 0x11d   :  { %126 = dma.vmem_to_hbm [thread:$0]  %s124_s21, 32, %s333_s3, [#allocation3]  }
 0x11e   :  { %238 = dma.done.wait [#allocation3], 32  }
 0x11f   :  { %239 = vsyncadd [#allocation3], 4294967264 }
 0x120   :  { %130 = vsyncpa [#allocation3], 1 }

</bundles_post_ra>
